<compile_context>
chip_gen: v7x
topology: tpu7x:2x2x1
jax: 0.10.0
libtpu: 0.0.40
codegen_flags: <defaults>
</compile_context>

<pallas_src>
import functools

import jax
import jax.numpy as jnp
from jax.experimental import pallas as pl
from jax.experimental.pallas import tpu as pltpu


def _tensor_fact_kernel(pat_tab_ref, meas_tab_ref, time_tab_ref, idx_ref, o_ref,
                        *, n_pat, n_meas, n_t, l_dim):
    """One grid step handles an (R, 128) batch tile.

    pat/meas/time_tab_ref : 1D f32 SMEM refs, row-major flattened (n_rows*l_dim,)
    idx_ref               : (3, R, 128) int32 VMEM block (pat / meas / t stacked)
    o_ref                 : (R, 128) f32 VMEM output block (lane- and sublane-dense)
    """
    idx_pat = idx_ref[0]      # (R, 128) int32
    idx_meas = idx_ref[1]     # (R, 128) int32
    idx_t = idx_ref[2]        # (R, 128) int32

    def gather_components(tab_ref, n_rows, idx):
        # Scalar-splat select gather (rev #2/#3): for each table row r, one
        # (R,128) compare, then one select per l-component with an SMEM scalar.
        # Pure VALU work; no XLU, no MXU, no broadcasts of table columns.
        comps = [jnp.zeros(idx.shape, jnp.float32) for _ in range(l_dim)]
        for r in range(n_rows):                      # static unroll (tables are tiny)
            mask = idx == r
            for l in range(l_dim):
                comps[l] = jnp.where(mask, tab_ref[r * l_dim + l], comps[l])
        return comps

    pat_c = gather_components(pat_tab_ref, n_pat, idx_pat)     # l_dim x (R,128)
    meas_c = gather_components(meas_tab_ref, n_meas, idx_meas)  # l_dim x (R,128)
    time_c = gather_components(time_tab_ref, n_t, idx_t)        # l_dim x (R,128)

    # .sum(1) over l_dim as an explicit unrolled VALU add (rev #3).
    acc = pat_c[0] * meas_c[0] * time_c[0]
    for l in range(1, l_dim):
        acc = acc + pat_c[l] * meas_c[l] * time_c[l]
    o_ref[...] = acc                                             # unmasked full-vreg store


def tensor_fact_forward(idx_pat, idx_meas, idx_t,
                        pat_w, meas_w, time_w,
                        beta_u, beta_w, covariates_u, cov_w_fixed,
                        *, block_rows=512):
    """Pallas forward pass. Returns (B,) float32, matching PyTorch .sum(1)."""
    B = idx_pat.shape[0]
    f32 = jnp.float32
    hp = jax.lax.Precision.HIGHEST

    n_pat, l_dim = pat_w.shape
    n_meas = meas_w.shape[0]
    n_t = time_w.shape[0]

    # One-time effective tables: the covariate projections depend only on the
    # table row, never on the batch (kept from previous revision).
    pat_eff = pat_w.astype(f32) + jnp.dot(covariates_u.astype(f32),
                                          beta_u.astype(f32), precision=hp)
    time_eff = time_w.astype(f32) + jnp.dot(cov_w_fixed.astype(f32),
                                            beta_w.astype(f32), precision=hp)
    meas_eff = meas_w.astype(f32)

    # Flatten tables row-major to 1D for compact SMEM residency (1D SMEM arrays
    # pad to next_pow2(4N) bytes; 2D would pad to [ceil/8*8, ceil/128*128]).
    pat_flat = pat_eff.reshape(-1)     # (n_pat * l_dim,)
    meas_flat = meas_eff.reshape(-1)   # (n_meas * l_dim,)
    time_flat = time_eff.reshape(-1)   # (n_t * l_dim,)

    # Batch tiling: 128 lanes x R sublanes per grid step (rev #1).
    LANES = 128
    rows_needed = pl.cdiv(B, LANES)
    R = min(block_rows, ((rows_needed + 7) // 8) * 8)   # multiple of 8, >= 8
    num_tiles = pl.cdiv(rows_needed, R)
    b_pad = num_tiles * R * LANES

    def prep(idx):
        idx = idx.astype(jnp.int32).reshape(-1)
        # Pad with index 0 (a valid row); padded results are sliced off below.
        return jnp.pad(idx, (0, b_pad - B))

    # Single stacked index input -> one input DMA per grid step (rev #6).
    idx_stack = jnp.stack([prep(idx_pat), prep(idx_meas), prep(idx_t)], axis=0)
    idx_stack = idx_stack.reshape(3, num_tiles, R, LANES).transpose(1, 0, 2, 3)

    kernel = functools.partial(_tensor_fact_kernel,
                               n_pat=n_pat, n_meas=n_meas, n_t=n_t, l_dim=l_dim)

    smem_spec = pl.BlockSpec(memory_space=pltpu.MemorySpace.SMEM)

    out = pl.pallas_call(
        kernel,
        out_shape=jax.ShapeDtypeStruct((num_tiles, R, LANES), f32),
        grid=(num_tiles,),
        in_specs=[smem_spec, smem_spec, smem_spec,
                  pl.BlockSpec((None, 3, R, LANES), lambda i: (i, 0, 0, 0))],
        out_specs=pl.BlockSpec((None, R, LANES), lambda i: (i, 0, 0)),
        # Batch axis is embarrassingly parallel -> both v7x TCs get work when
        # num_tiles >= 2.  Working set at R=512 is ~2 MiB double-buffered, so no
        # vmem_limit_bytes override is needed on any generation.
        compiler_params=pltpu.CompilerParams(dimension_semantics=("parallel",)),
    )(pat_flat, meas_flat, time_flat, idx_stack)

    return out.reshape(b_pad)[:B]


def reference_forward(idx_pat, idx_meas, idx_t,
                      pat_w, meas_w, time_w,
                      beta_u, beta_w, covariates_u, cov_w_fixed):
    hp = jax.lax.Precision.HIGHEST
    pat = pat_w[idx_pat] + jnp.dot(covariates_u[idx_pat], beta_u, precision=hp)
    mea = meas_w[idx_meas]
    tim = time_w[idx_t] + jnp.dot(cov_w_fixed[idx_t], beta_w, precision=hp)
    return (pat * mea * tim).sum(axis=1)


if __name__ == "__main__":
    # Module hyperparameters (n_w=1 so cov_w_fixed @ beta_w is well-formed).
    n_pat, n_meas, n_t, l_dim, n_u, n_w = 10, 5, 25, 2, 2, 1
    B = 8

    key = jax.random.PRNGKey(0)
    k1, k2, k3, k4, k5, k6, k7, k8, k9 = jax.random.split(key, 9)

    # Deterministic parameter init mirroring nn.Module.__init__.
    pat_w = 0.01 * jax.random.normal(k1, (n_pat, l_dim), jnp.float32)
    meas_w = 0.01 * jax.random.normal(k2, (n_meas, l_dim), jnp.float32)
    time_w = 0.005 * jax.random.normal(k3, (n_t, l_dim), jnp.float32)
    beta_u = jax.random.normal(k4, (n_u, l_dim), jnp.float32)
    beta_w = jax.random.normal(k5, (n_w, l_dim), jnp.float32)
    covariates_u = jax.random.normal(k6, (n_pat, n_u), jnp.float32)
    cov_w_fixed = jnp.arange(n_t, dtype=jnp.float32).reshape(n_t, 1)

    # Example index batch.
    idx_pat = jax.random.randint(k7, (B,), 0, n_pat, jnp.int32)
    idx_meas = jax.random.randint(k8, (B,), 0, n_meas, jnp.int32)
    idx_t = jax.random.randint(k9, (B,), 0, n_t, jnp.int32)

    pred = tensor_fact_forward(idx_pat, idx_meas, idx_t,
                               pat_w, meas_w, time_w,
                               beta_u, beta_w, covariates_u, cov_w_fixed)
    pred = jax.block_until_ready(pred)

    ref = reference_forward(idx_pat, idx_meas, idx_t,
                            pat_w, meas_w, time_w,
                            beta_u, beta_w, covariates_u, cov_w_fixed)
    assert pred.shape == (B,)
    assert jnp.allclose(pred, ref, atol=1e-5, rtol=1e-5)
    print("KERNEL_OK")
</pallas_src>

<mosaic_0001>
module attributes {stable_mosaic.version = 11 : i64} {
  func.func @_tensor_fact_kernel(%arg0: i32, %arg1: memref<20xf32, #tpu.memory_space<smem>>, %arg2: memref<10xf32, #tpu.memory_space<smem>>, %arg3: memref<50xf32, #tpu.memory_space<smem>>, %arg4: memref<1x3x8x128xi32, #tpu.memory_space<vmem>>, %arg5: memref<1x8x128xf32, #tpu.memory_space<vmem>>) attributes {dimension_semantics = [#tpu.dimension_semantics<parallel>], iteration_bounds = array<i64: 1>, scalar_prefetch = 0 : i64, scratch_operands = 0 : i64, tpu.core_type = #tpu.core_type<tc>, window_params = [{transform_indices = @transform_0, window_bounds = array<i64: 20>}, {transform_indices = @transform_1, window_bounds = array<i64: 10>}, {transform_indices = @transform_2, window_bounds = array<i64: 50>}, {transform_indices = @transform_3, window_bounds = array<i64: 1, 3, 8, 128>}, {transform_indices = @transform_4, window_bounds = array<i64: 1, 8, 128>}]} {
    %c0 = arith.constant 0 : index
    %c0_0 = arith.constant 0 : index
    %c0_1 = arith.constant 0 : index
    %c0_2 = arith.constant 0 : index
    %0 = vector.load %arg4[%c0, %c0_0, %c0_1, %c0_2] : memref<1x3x8x128xi32, #tpu.memory_space<vmem>>, vector<1x1x8x128xi32>
    %1 = vector.shape_cast %0 : vector<1x1x8x128xi32> to vector<8x128xi32>
    %c0_3 = arith.constant 0 : index
    %c1 = arith.constant 1 : index
    %c0_4 = arith.constant 0 : index
    %c0_5 = arith.constant 0 : index
    %2 = vector.load %arg4[%c0_3, %c1, %c0_4, %c0_5] : memref<1x3x8x128xi32, #tpu.memory_space<vmem>>, vector<1x1x8x128xi32>
    %3 = vector.shape_cast %2 : vector<1x1x8x128xi32> to vector<8x128xi32>
    %c0_6 = arith.constant 0 : index
    %c2 = arith.constant 2 : index
    %c0_7 = arith.constant 0 : index
    %c0_8 = arith.constant 0 : index
    %4 = vector.load %arg4[%c0_6, %c2, %c0_7, %c0_8] : memref<1x3x8x128xi32, #tpu.memory_space<vmem>>, vector<1x1x8x128xi32>
    %5 = vector.shape_cast %4 : vector<1x1x8x128xi32> to vector<8x128xi32>
    %cst = arith.constant 0.000000e+00 : f32
    %6 = vector.broadcast %cst : f32 to vector<8x128xf32>
    %cst_9 = arith.constant 0.000000e+00 : f32
    %7 = vector.broadcast %cst_9 : f32 to vector<8x128xf32>
    %c0_i32 = arith.constant 0 : i32
    %8 = vector.broadcast %c0_i32 : i32 to vector<8x128xi32>
    %9 = arith.cmpi eq, %1, %8 : vector<8x128xi32>
    %c0_10 = arith.constant 0 : index
    %10 = memref.load %arg1[%c0_10] : memref<20xf32, #tpu.memory_space<smem>>
    %11 = vector.broadcast %10 : f32 to vector<8x128xf32>
    %12 = arith.select %9, %11, %6 : vector<8x128xi1>, vector<8x128xf32>
    %c1_11 = arith.constant 1 : index
    %13 = memref.load %arg1[%c1_11] : memref<20xf32, #tpu.memory_space<smem>>
    %14 = vector.broadcast %13 : f32 to vector<8x128xf32>
    %15 = arith.select %9, %14, %7 : vector<8x128xi1>, vector<8x128xf32>
    %c1_i32 = arith.constant 1 : i32
    %16 = vector.broadcast %c1_i32 : i32 to vector<8x128xi32>
    %17 = arith.cmpi eq, %1, %16 : vector<8x128xi32>
    %c2_12 = arith.constant 2 : index
    %18 = memref.load %arg1[%c2_12] : memref<20xf32, #tpu.memory_space<smem>>
    %19 = vector.broadcast %18 : f32 to vector<8x128xf32>
    %20 = arith.select %17, %19, %12 : vector<8x128xi1>, vector<8x128xf32>
    %c3 = arith.constant 3 : index
    %21 = memref.load %arg1[%c3] : memref<20xf32, #tpu.memory_space<smem>>
    %22 = vector.broadcast %21 : f32 to vector<8x128xf32>
    %23 = arith.select %17, %22, %15 : vector<8x128xi1>, vector<8x128xf32>
    %c2_i32 = arith.constant 2 : i32
    %24 = vector.broadcast %c2_i32 : i32 to vector<8x128xi32>
    %25 = arith.cmpi eq, %1, %24 : vector<8x128xi32>
    %c4 = arith.constant 4 : index
    %26 = memref.load %arg1[%c4] : memref<20xf32, #tpu.memory_space<smem>>
    %27 = vector.broadcast %26 : f32 to vector<8x128xf32>
    %28 = arith.select %25, %27, %20 : vector<8x128xi1>, vector<8x128xf32>
    %c5 = arith.constant 5 : index
    %29 = memref.load %arg1[%c5] : memref<20xf32, #tpu.memory_space<smem>>
    %30 = vector.broadcast %29 : f32 to vector<8x128xf32>
    %31 = arith.select %25, %30, %23 : vector<8x128xi1>, vector<8x128xf32>
    %c3_i32 = arith.constant 3 : i32
    %32 = vector.broadcast %c3_i32 : i32 to vector<8x128xi32>
    %33 = arith.cmpi eq, %1, %32 : vector<8x128xi32>
    %c6 = arith.constant 6 : index
    %34 = memref.load %arg1[%c6] : memref<20xf32, #tpu.memory_space<smem>>
    %35 = vector.broadcast %34 : f32 to vector<8x128xf32>
    %36 = arith.select %33, %35, %28 : vector<8x128xi1>, vector<8x128xf32>
    %c7 = arith.constant 7 : index
    %37 = memref.load %arg1[%c7] : memref<20xf32, #tpu.memory_space<smem>>
    %38 = vector.broadcast %37 : f32 to vector<8x128xf32>
    %39 = arith.select %33, %38, %31 : vector<8x128xi1>, vector<8x128xf32>
    %c4_i32 = arith.constant 4 : i32
    %40 = vector.broadcast %c4_i32 : i32 to vector<8x128xi32>
    %41 = arith.cmpi eq, %1, %40 : vector<8x128xi32>
    %c8 = arith.constant 8 : index
    %42 = memref.load %arg1[%c8] : memref<20xf32, #tpu.memory_space<smem>>
    %43 = vector.broadcast %42 : f32 to vector<8x128xf32>
    %44 = arith.select %41, %43, %36 : vector<8x128xi1>, vector<8x128xf32>
    %c9 = arith.constant 9 : index
    %45 = memref.load %arg1[%c9] : memref<20xf32, #tpu.memory_space<smem>>
    %46 = vector.broadcast %45 : f32 to vector<8x128xf32>
    %47 = arith.select %41, %46, %39 : vector<8x128xi1>, vector<8x128xf32>
    %c5_i32 = arith.constant 5 : i32
    %48 = vector.broadcast %c5_i32 : i32 to vector<8x128xi32>
    %49 = arith.cmpi eq, %1, %48 : vector<8x128xi32>
    %c10 = arith.constant 10 : index
    %50 = memref.load %arg1[%c10] : memref<20xf32, #tpu.memory_space<smem>>
    %51 = vector.broadcast %50 : f32 to vector<8x128xf32>
    %52 = arith.select %49, %51, %44 : vector<8x128xi1>, vector<8x128xf32>
    %c11 = arith.constant 11 : index
    %53 = memref.load %arg1[%c11] : memref<20xf32, #tpu.memory_space<smem>>
    %54 = vector.broadcast %53 : f32 to vector<8x128xf32>
    %55 = arith.select %49, %54, %47 : vector<8x128xi1>, vector<8x128xf32>
    %c6_i32 = arith.constant 6 : i32
    %56 = vector.broadcast %c6_i32 : i32 to vector<8x128xi32>
    %57 = arith.cmpi eq, %1, %56 : vector<8x128xi32>
    %c12 = arith.constant 12 : index
    %58 = memref.load %arg1[%c12] : memref<20xf32, #tpu.memory_space<smem>>
    %59 = vector.broadcast %58 : f32 to vector<8x128xf32>
    %60 = arith.select %57, %59, %52 : vector<8x128xi1>, vector<8x128xf32>
    %c13 = arith.constant 13 : index
    %61 = memref.load %arg1[%c13] : memref<20xf32, #tpu.memory_space<smem>>
    %62 = vector.broadcast %61 : f32 to vector<8x128xf32>
    %63 = arith.select %57, %62, %55 : vector<8x128xi1>, vector<8x128xf32>
    %c7_i32 = arith.constant 7 : i32
    %64 = vector.broadcast %c7_i32 : i32 to vector<8x128xi32>
    %65 = arith.cmpi eq, %1, %64 : vector<8x128xi32>
    %c14 = arith.constant 14 : index
    %66 = memref.load %arg1[%c14] : memref<20xf32, #tpu.memory_space<smem>>
    %67 = vector.broadcast %66 : f32 to vector<8x128xf32>
    %68 = arith.select %65, %67, %60 : vector<8x128xi1>, vector<8x128xf32>
    %c15 = arith.constant 15 : index
    %69 = memref.load %arg1[%c15] : memref<20xf32, #tpu.memory_space<smem>>
    %70 = vector.broadcast %69 : f32 to vector<8x128xf32>
    %71 = arith.select %65, %70, %63 : vector<8x128xi1>, vector<8x128xf32>
    %c8_i32 = arith.constant 8 : i32
    %72 = vector.broadcast %c8_i32 : i32 to vector<8x128xi32>
    %73 = arith.cmpi eq, %1, %72 : vector<8x128xi32>
    %c16 = arith.constant 16 : index
    %74 = memref.load %arg1[%c16] : memref<20xf32, #tpu.memory_space<smem>>
    %75 = vector.broadcast %74 : f32 to vector<8x128xf32>
    %76 = arith.select %73, %75, %68 : vector<8x128xi1>, vector<8x128xf32>
    %c17 = arith.constant 17 : index
    %77 = memref.load %arg1[%c17] : memref<20xf32, #tpu.memory_space<smem>>
    %78 = vector.broadcast %77 : f32 to vector<8x128xf32>
    %79 = arith.select %73, %78, %71 : vector<8x128xi1>, vector<8x128xf32>
    %c9_i32 = arith.constant 9 : i32
    %80 = vector.broadcast %c9_i32 : i32 to vector<8x128xi32>
    %81 = arith.cmpi eq, %1, %80 : vector<8x128xi32>
    %c18 = arith.constant 18 : index
    %82 = memref.load %arg1[%c18] : memref<20xf32, #tpu.memory_space<smem>>
    %83 = vector.broadcast %82 : f32 to vector<8x128xf32>
    %84 = arith.select %81, %83, %76 : vector<8x128xi1>, vector<8x128xf32>
    %c19 = arith.constant 19 : index
    %85 = memref.load %arg1[%c19] : memref<20xf32, #tpu.memory_space<smem>>
    %86 = vector.broadcast %85 : f32 to vector<8x128xf32>
    %87 = arith.select %81, %86, %79 : vector<8x128xi1>, vector<8x128xf32>
    %cst_13 = arith.constant 0.000000e+00 : f32
    %88 = vector.broadcast %cst_13 : f32 to vector<8x128xf32>
    %cst_14 = arith.constant 0.000000e+00 : f32
    %89 = vector.broadcast %cst_14 : f32 to vector<8x128xf32>
    %c0_i32_15 = arith.constant 0 : i32
    %90 = vector.broadcast %c0_i32_15 : i32 to vector<8x128xi32>
    %91 = arith.cmpi eq, %3, %90 : vector<8x128xi32>
    %c0_16 = arith.constant 0 : index
    %92 = memref.load %arg2[%c0_16] : memref<10xf32, #tpu.memory_space<smem>>
    %93 = vector.broadcast %92 : f32 to vector<8x128xf32>
    %94 = arith.select %91, %93, %88 : vector<8x128xi1>, vector<8x128xf32>
    %c1_17 = arith.constant 1 : index
    %95 = memref.load %arg2[%c1_17] : memref<10xf32, #tpu.memory_space<smem>>
    %96 = vector.broadcast %95 : f32 to vector<8x128xf32>
    %97 = arith.select %91, %96, %89 : vector<8x128xi1>, vector<8x128xf32>
    %c1_i32_18 = arith.constant 1 : i32
    %98 = vector.broadcast %c1_i32_18 : i32 to vector<8x128xi32>
    %99 = arith.cmpi eq, %3, %98 : vector<8x128xi32>
    %c2_19 = arith.constant 2 : index
    %100 = memref.load %arg2[%c2_19] : memref<10xf32, #tpu.memory_space<smem>>
    %101 = vector.broadcast %100 : f32 to vector<8x128xf32>
    %102 = arith.select %99, %101, %94 : vector<8x128xi1>, vector<8x128xf32>
    %c3_20 = arith.constant 3 : index
    %103 = memref.load %arg2[%c3_20] : memref<10xf32, #tpu.memory_space<smem>>
    %104 = vector.broadcast %103 : f32 to vector<8x128xf32>
    %105 = arith.select %99, %104, %97 : vector<8x128xi1>, vector<8x128xf32>
    %c2_i32_21 = arith.constant 2 : i32
    %106 = vector.broadcast %c2_i32_21 : i32 to vector<8x128xi32>
    %107 = arith.cmpi eq, %3, %106 : vector<8x128xi32>
    %c4_22 = arith.constant 4 : index
    %108 = memref.load %arg2[%c4_22] : memref<10xf32, #tpu.memory_space<smem>>
    %109 = vector.broadcast %108 : f32 to vector<8x128xf32>
    %110 = arith.select %107, %109, %102 : vector<8x128xi1>, vector<8x128xf32>
    %c5_23 = arith.constant 5 : index
    %111 = memref.load %arg2[%c5_23] : memref<10xf32, #tpu.memory_space<smem>>
    %112 = vector.broadcast %111 : f32 to vector<8x128xf32>
    %113 = arith.select %107, %112, %105 : vector<8x128xi1>, vector<8x128xf32>
    %c3_i32_24 = arith.constant 3 : i32
    %114 = vector.broadcast %c3_i32_24 : i32 to vector<8x128xi32>
    %115 = arith.cmpi eq, %3, %114 : vector<8x128xi32>
    %c6_25 = arith.constant 6 : index
    %116 = memref.load %arg2[%c6_25] : memref<10xf32, #tpu.memory_space<smem>>
    %117 = vector.broadcast %116 : f32 to vector<8x128xf32>
    %118 = arith.select %115, %117, %110 : vector<8x128xi1>, vector<8x128xf32>
    %c7_26 = arith.constant 7 : index
    %119 = memref.load %arg2[%c7_26] : memref<10xf32, #tpu.memory_space<smem>>
    %120 = vector.broadcast %119 : f32 to vector<8x128xf32>
    %121 = arith.select %115, %120, %113 : vector<8x128xi1>, vector<8x128xf32>
    %c4_i32_27 = arith.constant 4 : i32
    %122 = vector.broadcast %c4_i32_27 : i32 to vector<8x128xi32>
    %123 = arith.cmpi eq, %3, %122 : vector<8x128xi32>
    %c8_28 = arith.constant 8 : index
    %124 = memref.load %arg2[%c8_28] : memref<10xf32, #tpu.memory_space<smem>>
    %125 = vector.broadcast %124 : f32 to vector<8x128xf32>
    %126 = arith.select %123, %125, %118 : vector<8x128xi1>, vector<8x128xf32>
    %c9_29 = arith.constant 9 : index
    %127 = memref.load %arg2[%c9_29] : memref<10xf32, #tpu.memory_space<smem>>
    %128 = vector.broadcast %127 : f32 to vector<8x128xf32>
    %129 = arith.select %123, %128, %121 : vector<8x128xi1>, vector<8x128xf32>
    %cst_30 = arith.constant 0.000000e+00 : f32
    %130 = vector.broadcast %cst_30 : f32 to vector<8x128xf32>
    %cst_31 = arith.constant 0.000000e+00 : f32
    %131 = vector.broadcast %cst_31 : f32 to vector<8x128xf32>
    %c0_i32_32 = arith.constant 0 : i32
    %132 = vector.broadcast %c0_i32_32 : i32 to vector<8x128xi32>
    %133 = arith.cmpi eq, %5, %132 : vector<8x128xi32>
    %c0_33 = arith.constant 0 : index
    %134 = memref.load %arg3[%c0_33] : memref<50xf32, #tpu.memory_space<smem>>
    %135 = vector.broadcast %134 : f32 to vector<8x128xf32>
    %136 = arith.select %133, %135, %130 : vector<8x128xi1>, vector<8x128xf32>
    %c1_34 = arith.constant 1 : index
    %137 = memref.load %arg3[%c1_34] : memref<50xf32, #tpu.memory_space<smem>>
    %138 = vector.broadcast %137 : f32 to vector<8x128xf32>
    %139 = arith.select %133, %138, %131 : vector<8x128xi1>, vector<8x128xf32>
    %c1_i32_35 = arith.constant 1 : i32
    %140 = vector.broadcast %c1_i32_35 : i32 to vector<8x128xi32>
    %141 = arith.cmpi eq, %5, %140 : vector<8x128xi32>
    %c2_36 = arith.constant 2 : index
    %142 = memref.load %arg3[%c2_36] : memref<50xf32, #tpu.memory_space<smem>>
    %143 = vector.broadcast %142 : f32 to vector<8x128xf32>
    %144 = arith.select %141, %143, %136 : vector<8x128xi1>, vector<8x128xf32>
    %c3_37 = arith.constant 3 : index
    %145 = memref.load %arg3[%c3_37] : memref<50xf32, #tpu.memory_space<smem>>
    %146 = vector.broadcast %145 : f32 to vector<8x128xf32>
    %147 = arith.select %141, %146, %139 : vector<8x128xi1>, vector<8x128xf32>
    %c2_i32_38 = arith.constant 2 : i32
    %148 = vector.broadcast %c2_i32_38 : i32 to vector<8x128xi32>
    %149 = arith.cmpi eq, %5, %148 : vector<8x128xi32>
    %c4_39 = arith.constant 4 : index
    %150 = memref.load %arg3[%c4_39] : memref<50xf32, #tpu.memory_space<smem>>
    %151 = vector.broadcast %150 : f32 to vector<8x128xf32>
    %152 = arith.select %149, %151, %144 : vector<8x128xi1>, vector<8x128xf32>
    %c5_40 = arith.constant 5 : index
    %153 = memref.load %arg3[%c5_40] : memref<50xf32, #tpu.memory_space<smem>>
    %154 = vector.broadcast %153 : f32 to vector<8x128xf32>
    %155 = arith.select %149, %154, %147 : vector<8x128xi1>, vector<8x128xf32>
    %c3_i32_41 = arith.constant 3 : i32
    %156 = vector.broadcast %c3_i32_41 : i32 to vector<8x128xi32>
    %157 = arith.cmpi eq, %5, %156 : vector<8x128xi32>
    %c6_42 = arith.constant 6 : index
    %158 = memref.load %arg3[%c6_42] : memref<50xf32, #tpu.memory_space<smem>>
    %159 = vector.broadcast %158 : f32 to vector<8x128xf32>
    %160 = arith.select %157, %159, %152 : vector<8x128xi1>, vector<8x128xf32>
    %c7_43 = arith.constant 7 : index
    %161 = memref.load %arg3[%c7_43] : memref<50xf32, #tpu.memory_space<smem>>
    %162 = vector.broadcast %161 : f32 to vector<8x128xf32>
    %163 = arith.select %157, %162, %155 : vector<8x128xi1>, vector<8x128xf32>
    %c4_i32_44 = arith.constant 4 : i32
    %164 = vector.broadcast %c4_i32_44 : i32 to vector<8x128xi32>
    %165 = arith.cmpi eq, %5, %164 : vector<8x128xi32>
    %c8_45 = arith.constant 8 : index
    %166 = memref.load %arg3[%c8_45] : memref<50xf32, #tpu.memory_space<smem>>
    %167 = vector.broadcast %166 : f32 to vector<8x128xf32>
    %168 = arith.select %165, %167, %160 : vector<8x128xi1>, vector<8x128xf32>
    %c9_46 = arith.constant 9 : index
    %169 = memref.load %arg3[%c9_46] : memref<50xf32, #tpu.memory_space<smem>>
    %170 = vector.broadcast %169 : f32 to vector<8x128xf32>
    %171 = arith.select %165, %170, %163 : vector<8x128xi1>, vector<8x128xf32>
    %c5_i32_47 = arith.constant 5 : i32
    %172 = vector.broadcast %c5_i32_47 : i32 to vector<8x128xi32>
    %173 = arith.cmpi eq, %5, %172 : vector<8x128xi32>
    %c10_48 = arith.constant 10 : index
    %174 = memref.load %arg3[%c10_48] : memref<50xf32, #tpu.memory_space<smem>>
    %175 = vector.broadcast %174 : f32 to vector<8x128xf32>
    %176 = arith.select %173, %175, %168 : vector<8x128xi1>, vector<8x128xf32>
    %c11_49 = arith.constant 11 : index
    %177 = memref.load %arg3[%c11_49] : memref<50xf32, #tpu.memory_space<smem>>
    %178 = vector.broadcast %177 : f32 to vector<8x128xf32>
    %179 = arith.select %173, %178, %171 : vector<8x128xi1>, vector<8x128xf32>
    %c6_i32_50 = arith.constant 6 : i32
    %180 = vector.broadcast %c6_i32_50 : i32 to vector<8x128xi32>
    %181 = arith.cmpi eq, %5, %180 : vector<8x128xi32>
    %c12_51 = arith.constant 12 : index
    %182 = memref.load %arg3[%c12_51] : memref<50xf32, #tpu.memory_space<smem>>
    %183 = vector.broadcast %182 : f32 to vector<8x128xf32>
    %184 = arith.select %181, %183, %176 : vector<8x128xi1>, vector<8x128xf32>
    %c13_52 = arith.constant 13 : index
    %185 = memref.load %arg3[%c13_52] : memref<50xf32, #tpu.memory_space<smem>>
    %186 = vector.broadcast %185 : f32 to vector<8x128xf32>
    %187 = arith.select %181, %186, %179 : vector<8x128xi1>, vector<8x128xf32>
    %c7_i32_53 = arith.constant 7 : i32
    %188 = vector.broadcast %c7_i32_53 : i32 to vector<8x128xi32>
    %189 = arith.cmpi eq, %5, %188 : vector<8x128xi32>
    %c14_54 = arith.constant 14 : index
    %190 = memref.load %arg3[%c14_54] : memref<50xf32, #tpu.memory_space<smem>>
    %191 = vector.broadcast %190 : f32 to vector<8x128xf32>
    %192 = arith.select %189, %191, %184 : vector<8x128xi1>, vector<8x128xf32>
    %c15_55 = arith.constant 15 : index
    %193 = memref.load %arg3[%c15_55] : memref<50xf32, #tpu.memory_space<smem>>
    %194 = vector.broadcast %193 : f32 to vector<8x128xf32>
    %195 = arith.select %189, %194, %187 : vector<8x128xi1>, vector<8x128xf32>
    %c8_i32_56 = arith.constant 8 : i32
    %196 = vector.broadcast %c8_i32_56 : i32 to vector<8x128xi32>
    %197 = arith.cmpi eq, %5, %196 : vector<8x128xi32>
    %c16_57 = arith.constant 16 : index
    %198 = memref.load %arg3[%c16_57] : memref<50xf32, #tpu.memory_space<smem>>
    %199 = vector.broadcast %198 : f32 to vector<8x128xf32>
    %200 = arith.select %197, %199, %192 : vector<8x128xi1>, vector<8x128xf32>
    %c17_58 = arith.constant 17 : index
    %201 = memref.load %arg3[%c17_58] : memref<50xf32, #tpu.memory_space<smem>>
    %202 = vector.broadcast %201 : f32 to vector<8x128xf32>
    %203 = arith.select %197, %202, %195 : vector<8x128xi1>, vector<8x128xf32>
    %c9_i32_59 = arith.constant 9 : i32
    %204 = vector.broadcast %c9_i32_59 : i32 to vector<8x128xi32>
    %205 = arith.cmpi eq, %5, %204 : vector<8x128xi32>
    %c18_60 = arith.constant 18 : index
    %206 = memref.load %arg3[%c18_60] : memref<50xf32, #tpu.memory_space<smem>>
    %207 = vector.broadcast %206 : f32 to vector<8x128xf32>
    %208 = arith.select %205, %207, %200 : vector<8x128xi1>, vector<8x128xf32>
    %c19_61 = arith.constant 19 : index
    %209 = memref.load %arg3[%c19_61] : memref<50xf32, #tpu.memory_space<smem>>
    %210 = vector.broadcast %209 : f32 to vector<8x128xf32>
    %211 = arith.select %205, %210, %203 : vector<8x128xi1>, vector<8x128xf32>
    %c10_i32 = arith.constant 10 : i32
    %212 = vector.broadcast %c10_i32 : i32 to vector<8x128xi32>
    %213 = arith.cmpi eq, %5, %212 : vector<8x128xi32>
    %c20 = arith.constant 20 : index
    %214 = memref.load %arg3[%c20] : memref<50xf32, #tpu.memory_space<smem>>
    %215 = vector.broadcast %214 : f32 to vector<8x128xf32>
    %216 = arith.select %213, %215, %208 : vector<8x128xi1>, vector<8x128xf32>
    %c21 = arith.constant 21 : index
    %217 = memref.load %arg3[%c21] : memref<50xf32, #tpu.memory_space<smem>>
    %218 = vector.broadcast %217 : f32 to vector<8x128xf32>
    %219 = arith.select %213, %218, %211 : vector<8x128xi1>, vector<8x128xf32>
    %c11_i32 = arith.constant 11 : i32
    %220 = vector.broadcast %c11_i32 : i32 to vector<8x128xi32>
    %221 = arith.cmpi eq, %5, %220 : vector<8x128xi32>
    %c22 = arith.constant 22 : index
    %222 = memref.load %arg3[%c22] : memref<50xf32, #tpu.memory_space<smem>>
    %223 = vector.broadcast %222 : f32 to vector<8x128xf32>
    %224 = arith.select %221, %223, %216 : vector<8x128xi1>, vector<8x128xf32>
    %c23 = arith.constant 23 : index
    %225 = memref.load %arg3[%c23] : memref<50xf32, #tpu.memory_space<smem>>
    %226 = vector.broadcast %225 : f32 to vector<8x128xf32>
    %227 = arith.select %221, %226, %219 : vector<8x128xi1>, vector<8x128xf32>
    %c12_i32 = arith.constant 12 : i32
    %228 = vector.broadcast %c12_i32 : i32 to vector<8x128xi32>
    %229 = arith.cmpi eq, %5, %228 : vector<8x128xi32>
    %c24 = arith.constant 24 : index
    %230 = memref.load %arg3[%c24] : memref<50xf32, #tpu.memory_space<smem>>
    %231 = vector.broadcast %230 : f32 to vector<8x128xf32>
    %232 = arith.select %229, %231, %224 : vector<8x128xi1>, vector<8x128xf32>
    %c25 = arith.constant 25 : index
    %233 = memref.load %arg3[%c25] : memref<50xf32, #tpu.memory_space<smem>>
    %234 = vector.broadcast %233 : f32 to vector<8x128xf32>
    %235 = arith.select %229, %234, %227 : vector<8x128xi1>, vector<8x128xf32>
    %c13_i32 = arith.constant 13 : i32
    %236 = vector.broadcast %c13_i32 : i32 to vector<8x128xi32>
    %237 = arith.cmpi eq, %5, %236 : vector<8x128xi32>
    %c26 = arith.constant 26 : index
    %238 = memref.load %arg3[%c26] : memref<50xf32, #tpu.memory_space<smem>>
    %239 = vector.broadcast %238 : f32 to vector<8x128xf32>
    %240 = arith.select %237, %239, %232 : vector<8x128xi1>, vector<8x128xf32>
    %c27 = arith.constant 27 : index
    %241 = memref.load %arg3[%c27] : memref<50xf32, #tpu.memory_space<smem>>
    %242 = vector.broadcast %241 : f32 to vector<8x128xf32>
    %243 = arith.select %237, %242, %235 : vector<8x128xi1>, vector<8x128xf32>
    %c14_i32 = arith.constant 14 : i32
    %244 = vector.broadcast %c14_i32 : i32 to vector<8x128xi32>
    %245 = arith.cmpi eq, %5, %244 : vector<8x128xi32>
    %c28 = arith.constant 28 : index
    %246 = memref.load %arg3[%c28] : memref<50xf32, #tpu.memory_space<smem>>
    %247 = vector.broadcast %246 : f32 to vector<8x128xf32>
    %248 = arith.select %245, %247, %240 : vector<8x128xi1>, vector<8x128xf32>
    %c29 = arith.constant 29 : index
    %249 = memref.load %arg3[%c29] : memref<50xf32, #tpu.memory_space<smem>>
    %250 = vector.broadcast %249 : f32 to vector<8x128xf32>
    %251 = arith.select %245, %250, %243 : vector<8x128xi1>, vector<8x128xf32>
    %c15_i32 = arith.constant 15 : i32
    %252 = vector.broadcast %c15_i32 : i32 to vector<8x128xi32>
    %253 = arith.cmpi eq, %5, %252 : vector<8x128xi32>
    %c30 = arith.constant 30 : index
    %254 = memref.load %arg3[%c30] : memref<50xf32, #tpu.memory_space<smem>>
    %255 = vector.broadcast %254 : f32 to vector<8x128xf32>
    %256 = arith.select %253, %255, %248 : vector<8x128xi1>, vector<8x128xf32>
    %c31 = arith.constant 31 : index
    %257 = memref.load %arg3[%c31] : memref<50xf32, #tpu.memory_space<smem>>
    %258 = vector.broadcast %257 : f32 to vector<8x128xf32>
    %259 = arith.select %253, %258, %251 : vector<8x128xi1>, vector<8x128xf32>
    %c16_i32 = arith.constant 16 : i32
    %260 = vector.broadcast %c16_i32 : i32 to vector<8x128xi32>
    %261 = arith.cmpi eq, %5, %260 : vector<8x128xi32>
    %c32 = arith.constant 32 : index
    %262 = memref.load %arg3[%c32] : memref<50xf32, #tpu.memory_space<smem>>
    %263 = vector.broadcast %262 : f32 to vector<8x128xf32>
    %264 = arith.select %261, %263, %256 : vector<8x128xi1>, vector<8x128xf32>
    %c33 = arith.constant 33 : index
    %265 = memref.load %arg3[%c33] : memref<50xf32, #tpu.memory_space<smem>>
    %266 = vector.broadcast %265 : f32 to vector<8x128xf32>
    %267 = arith.select %261, %266, %259 : vector<8x128xi1>, vector<8x128xf32>
    %c17_i32 = arith.constant 17 : i32
    %268 = vector.broadcast %c17_i32 : i32 to vector<8x128xi32>
    %269 = arith.cmpi eq, %5, %268 : vector<8x128xi32>
    %c34 = arith.constant 34 : index
    %270 = memref.load %arg3[%c34] : memref<50xf32, #tpu.memory_space<smem>>
    %271 = vector.broadcast %270 : f32 to vector<8x128xf32>
    %272 = arith.select %269, %271, %264 : vector<8x128xi1>, vector<8x128xf32>
    %c35 = arith.constant 35 : index
    %273 = memref.load %arg3[%c35] : memref<50xf32, #tpu.memory_space<smem>>
    %274 = vector.broadcast %273 : f32 to vector<8x128xf32>
    %275 = arith.select %269, %274, %267 : vector<8x128xi1>, vector<8x128xf32>
    %c18_i32 = arith.constant 18 : i32
    %276 = vector.broadcast %c18_i32 : i32 to vector<8x128xi32>
    %277 = arith.cmpi eq, %5, %276 : vector<8x128xi32>
    %c36 = arith.constant 36 : index
    %278 = memref.load %arg3[%c36] : memref<50xf32, #tpu.memory_space<smem>>
    %279 = vector.broadcast %278 : f32 to vector<8x128xf32>
    %280 = arith.select %277, %279, %272 : vector<8x128xi1>, vector<8x128xf32>
    %c37 = arith.constant 37 : index
    %281 = memref.load %arg3[%c37] : memref<50xf32, #tpu.memory_space<smem>>
    %282 = vector.broadcast %281 : f32 to vector<8x128xf32>
    %283 = arith.select %277, %282, %275 : vector<8x128xi1>, vector<8x128xf32>
    %c19_i32 = arith.constant 19 : i32
    %284 = vector.broadcast %c19_i32 : i32 to vector<8x128xi32>
    %285 = arith.cmpi eq, %5, %284 : vector<8x128xi32>
    %c38 = arith.constant 38 : index
    %286 = memref.load %arg3[%c38] : memref<50xf32, #tpu.memory_space<smem>>
    %287 = vector.broadcast %286 : f32 to vector<8x128xf32>
    %288 = arith.select %285, %287, %280 : vector<8x128xi1>, vector<8x128xf32>
    %c39 = arith.constant 39 : index
    %289 = memref.load %arg3[%c39] : memref<50xf32, #tpu.memory_space<smem>>
    %290 = vector.broadcast %289 : f32 to vector<8x128xf32>
    %291 = arith.select %285, %290, %283 : vector<8x128xi1>, vector<8x128xf32>
    %c20_i32 = arith.constant 20 : i32
    %292 = vector.broadcast %c20_i32 : i32 to vector<8x128xi32>
    %293 = arith.cmpi eq, %5, %292 : vector<8x128xi32>
    %c40 = arith.constant 40 : index
    %294 = memref.load %arg3[%c40] : memref<50xf32, #tpu.memory_space<smem>>
    %295 = vector.broadcast %294 : f32 to vector<8x128xf32>
    %296 = arith.select %293, %295, %288 : vector<8x128xi1>, vector<8x128xf32>
    %c41 = arith.constant 41 : index
    %297 = memref.load %arg3[%c41] : memref<50xf32, #tpu.memory_space<smem>>
    %298 = vector.broadcast %297 : f32 to vector<8x128xf32>
    %299 = arith.select %293, %298, %291 : vector<8x128xi1>, vector<8x128xf32>
    %c21_i32 = arith.constant 21 : i32
    %300 = vector.broadcast %c21_i32 : i32 to vector<8x128xi32>
    %301 = arith.cmpi eq, %5, %300 : vector<8x128xi32>
    %c42 = arith.constant 42 : index
    %302 = memref.load %arg3[%c42] : memref<50xf32, #tpu.memory_space<smem>>
    %303 = vector.broadcast %302 : f32 to vector<8x128xf32>
    %304 = arith.select %301, %303, %296 : vector<8x128xi1>, vector<8x128xf32>
    %c43 = arith.constant 43 : index
    %305 = memref.load %arg3[%c43] : memref<50xf32, #tpu.memory_space<smem>>
    %306 = vector.broadcast %305 : f32 to vector<8x128xf32>
    %307 = arith.select %301, %306, %299 : vector<8x128xi1>, vector<8x128xf32>
    %c22_i32 = arith.constant 22 : i32
    %308 = vector.broadcast %c22_i32 : i32 to vector<8x128xi32>
    %309 = arith.cmpi eq, %5, %308 : vector<8x128xi32>
    %c44 = arith.constant 44 : index
    %310 = memref.load %arg3[%c44] : memref<50xf32, #tpu.memory_space<smem>>
    %311 = vector.broadcast %310 : f32 to vector<8x128xf32>
    %312 = arith.select %309, %311, %304 : vector<8x128xi1>, vector<8x128xf32>
    %c45 = arith.constant 45 : index
    %313 = memref.load %arg3[%c45] : memref<50xf32, #tpu.memory_space<smem>>
    %314 = vector.broadcast %313 : f32 to vector<8x128xf32>
    %315 = arith.select %309, %314, %307 : vector<8x128xi1>, vector<8x128xf32>
    %c23_i32 = arith.constant 23 : i32
    %316 = vector.broadcast %c23_i32 : i32 to vector<8x128xi32>
    %317 = arith.cmpi eq, %5, %316 : vector<8x128xi32>
    %c46 = arith.constant 46 : index
    %318 = memref.load %arg3[%c46] : memref<50xf32, #tpu.memory_space<smem>>
    %319 = vector.broadcast %318 : f32 to vector<8x128xf32>
    %320 = arith.select %317, %319, %312 : vector<8x128xi1>, vector<8x128xf32>
    %c47 = arith.constant 47 : index
    %321 = memref.load %arg3[%c47] : memref<50xf32, #tpu.memory_space<smem>>
    %322 = vector.broadcast %321 : f32 to vector<8x128xf32>
    %323 = arith.select %317, %322, %315 : vector<8x128xi1>, vector<8x128xf32>
    %c24_i32 = arith.constant 24 : i32
    %324 = vector.broadcast %c24_i32 : i32 to vector<8x128xi32>
    %325 = arith.cmpi eq, %5, %324 : vector<8x128xi32>
    %c48 = arith.constant 48 : index
    %326 = memref.load %arg3[%c48] : memref<50xf32, #tpu.memory_space<smem>>
    %327 = vector.broadcast %326 : f32 to vector<8x128xf32>
    %328 = arith.select %325, %327, %320 : vector<8x128xi1>, vector<8x128xf32>
    %c49 = arith.constant 49 : index
    %329 = memref.load %arg3[%c49] : memref<50xf32, #tpu.memory_space<smem>>
    %330 = vector.broadcast %329 : f32 to vector<8x128xf32>
    %331 = arith.select %325, %330, %323 : vector<8x128xi1>, vector<8x128xf32>
    %332 = arith.mulf %84, %126 : vector<8x128xf32>
    %333 = arith.mulf %332, %328 : vector<8x128xf32>
    %334 = arith.mulf %87, %129 : vector<8x128xf32>
    %335 = arith.mulf %334, %331 : vector<8x128xf32>
    %336 = arith.addf %333, %335 : vector<8x128xf32>
    %c0_62 = arith.constant 0 : index
    %c0_63 = arith.constant 0 : index
    %c0_64 = arith.constant 0 : index
    %337 = vector.load %arg5[%c0_62, %c0_63, %c0_64] : memref<1x8x128xf32, #tpu.memory_space<vmem>>, vector<1x8x128xf32>
    %338 = vector.shape_cast %337 : vector<1x8x128xf32> to vector<8x128xf32>
    %339 = vector.shape_cast %336 : vector<8x128xf32> to vector<1x8x128xf32>
    tpu.vector_store %arg5[%c0_62, %c0_63, %c0_64], %339 {strides = array<i32>} : memref<1x8x128xf32, #tpu.memory_space<vmem>>, vector<1x8x128xf32>,
    return
  }
  func.func @transform_0(%arg0: i32) -> i32 {
    %c0_i32 = arith.constant 0 : i32
    %c0_i32_0 = arith.constant 0 : i32
    return %c0_i32 : i32
  }
  func.func @transform_1(%arg0: i32) -> i32 {
    %c0_i32 = arith.constant 0 : i32
    %c0_i32_0 = arith.constant 0 : i32
    return %c0_i32 : i32
  }
  func.func @transform_2(%arg0: i32) -> i32 {
    %c0_i32 = arith.constant 0 : i32
    %c0_i32_0 = arith.constant 0 : i32
    return %c0_i32 : i32
  }
  func.func @transform_3(%arg0: i32) -> (i32, i32, i32, i32) {
    %c0_i32 = arith.constant 0 : i32
    %c0_i32_0 = arith.constant 0 : i32
    %c0_i32_1 = arith.constant 0 : i32
    %c0_i32_2 = arith.constant 0 : i32
    return %arg0, %c0_i32, %c0_i32_0, %c0_i32_1 : i32, i32, i32, i32
  }
  func.func @transform_4(%arg0: i32) -> (i32, i32, i32) {
    %c0_i32 = arith.constant 0 : i32
    %c0_i32_0 = arith.constant 0 : i32
    %c0_i32_1 = arith.constant 0 : i32
    return %arg0, %c0_i32, %c0_i32_0 : i32, i32, i32
  }
}

</mosaic_0001>

<bundles_post_ra>
// kernel: tpu_custom_call.1
= control target key start
LH: loop header
LB: loop body
LE: loop exit
PB: predicated region body
PF: predicated region fallthrough
CT: control target
= control target key end

     0   :  { %9 = vsyncpa [#allocation5], 0  ;;  %s963_s0 = inlined_call_operand.hbm [shape: f32[20], index: 0, kind: input, shape index: {}]   ;;  %s964_s1 = inlined_call_operand.vmem [shape: f32[10], index: 1, kind: input, shape index: {}]   ;;  %s965_s2 = inlined_call_operand.vmem [shape: f32[50], index: 2, kind: input, shape index: {}]   ;;  %s966_s3 = inlined_call_operand.hbm [shape: s32[1,3,8,128], index: 3, kind: input, shape index: {}]   ;;  %s967_s4 = inlined_call_operand.hbm [shape: f32[1,8,128], index: 4, kind: output, shape index: {}]  }
   0x1   :  { %10 = vsyncpa [#allocation6], 0 }
   0x2   :  { %11 = vsyncpa [#allocation9], 0 }
   0x3   :  { %12 = vsyncpa [#allocation3], 0 }
   0x4   :  { %13 = vsyncpa [#allocation4], 0  ;;  %s28_s17 = sshll.u32 %s964_s1, 4  ;;  %s460_s20 = scalar_lea.hbm %s963_s0, 16  ;;  %s29_s17 = int_to_ptr.vmem [resolvable:$true] %s28_s17 }
   0x5   :  { %p461_p0 = scmp.ne.s32.totalorder %s963_s0, %s460_s20  ;;  %p464_p1 = scmp.lt.u32.totalorder %s460_s20, %s963_s0 }
   0x7   :  { %p466_p2 = pnand %p464_p1, %p461_p0 }
   0x9   :  { %469 = shalt.err (!%p466_p2)
}
   0xa   :  { %s548_s25 = smov [#allocation2]   ;;  %s470_s1 = scalar_lea.vmem %s29_s17, 16 }
   0xb   :  { %21 = dma.hbm_to_smem %s963_s0, 16, %s548_s25, [#allocation5]  }
   0xc   :  { %p471_p3 = scmp.ne.s32.totalorder %s29_s17, %s470_s1  ;;  %p475_p4 = scmp.lt.s32.totalorder %s29_s17, %s29_s17 }
   0xd   :  { %p476_p5 = scmp.lt.s32.totalorder %s470_s1, %s470_s1 }
   0xf   :  { %p477_p6 = por %p476_p5, %p475_p4 }
  0x11   :  { %p478_p7 = pnand %p477_p6, %p471_p3 }
  0x13   :  { %481 = shalt.err (!%p478_p7)
}
  0x14   :  { %s549_s28 = smov [#allocation7]   ;;  %s38_s5 = sshll.u32 %s965_s2, 4  ;;  %s39_s5 = int_to_ptr.vmem [resolvable:$true] %s38_s5 }
  0x15   :  { %31 = dma.vmem_to_smem %s29_s17, 16, %s549_s28, [#allocation6]  }
  0x16   :  { %s482_s6 = scalar_lea.vmem %s39_s5, 16  ;;  %p487_p9 = scmp.lt.s32.totalorder %s39_s5, %s39_s5 }
  0x17   :  { %p483_p8 = scmp.ne.s32.totalorder %s39_s5, %s482_s6  ;;  %p488_p10 = scmp.lt.s32.totalorder %s482_s6, %s482_s6 }
  0x19   :  { %p489_p11 = por %p488_p10, %p487_p9 }
  0x1b   :  { %p490_p12 = pnand %p489_p11, %p483_p8 }
  0x1d   :  { %493 = shalt.err (!%p490_p12)
}
  0x1e   :  { %s550_s0 = smov [#allocation8]   ;;  %s551_s7 = smov [#allocation10]  }
  0x1f   :  { %41 = dma.vmem_to_smem %s39_s5, 16, %s550_s0, [#allocation9]  }
  0x20   :  { %s47_s8 = sshll.u32 %s551_s7, 4  ;;  %s494_s11 = scalar_lea.hbm %s966_s3, 384  ;;  %s48_s8 = int_to_ptr.vmem [resolvable:$true] %s47_s8 }
  0x21   :  { %p495_p13 = scmp.ne.s32.totalorder %s966_s3, %s494_s11  ;;  %p498_p0 = scmp.lt.u32.totalorder %s494_s11, %s966_s3 }
  0x23   :  { %p500_p1 = pnand %p498_p0, %p495_p13 }
  0x25   :  { %503 = shalt.err (!%p500_p1)
}
  0x26   :  { %s504_s15 = scalar_lea.vmem %s48_s8, 384  ;;  %p509_p3 = scmp.lt.s32.totalorder %s48_s8, %s48_s8 }
  0x27   :  { %p505_p2 = scmp.ne.s32.totalorder %s48_s8, %s504_s15  ;;  %p510_p4 = scmp.lt.s32.totalorder %s504_s15, %s504_s15 }
  0x29   :  { %p511_p5 = por %p510_p4, %p509_p3 }
  0x2b   :  { %p512_p6 = pnand %p511_p5, %p505_p2 }
  0x2d   :  { %515 = shalt.err (!%p512_p6)
}
  0x2e   :  { %s552_s16 = smov 128   ;;  %s553_s17 = smov 8  }
  0x2f   :  { %53 = dma.hbm_to_vmem [thread:$0]  %s966_s3, 384, %s48_s8, [#allocation3], %s552_s16, %s552_s16, %s553_s17  }
  0x30   :  { %538 = dma.done.wait [#allocation5], 16  }
  0x31   :  { %539 = vsyncadd [#allocation5], 4294967280 }
  0x32   :  { %540 = dma.done.wait [#allocation6], 16  }
  0x33   :  { %541 = vsyncadd [#allocation6], 4294967280 }
  0x34   :  { %542 = dma.done.wait [#allocation9], 16  }
  0x35   :  { %543 = vsyncadd [#allocation9], 4294967280 }
  0x36   :  { %544 = dma.done.wait [#allocation3], 384  }
  0x37   :  { %545 = vsyncadd [#allocation3], 4294966912 }
  0x38   :  { %66 = sfence }
  0x39   :  { %v610_v0 = vld [vmem:[#allocation10] sm:$0xff]  ;;  %s73_s20 = sld [smem:[#allocation2]]  ;;  %v612_v1 = vld [vmem:[#allocation10 + $0x8] sm:$0xff]  ;;  %s376_s21 = sld [smem:[#allocation2 + $0x1]]  ;;  %v767_v50 = vld [vmem:[#allocation10 + $0x10] sm:$0xff] }
  0x3a   :  { %vm72_vm0 = vcmp.eq.s32.totalorder %v610_v0, 0  ;;  %s377_s22 = sld [smem:[#allocation2 + $0x2]]  ;;  %vm79_vm1 = vcmp.eq.s32.totalorder %v610_v0, 1  ;;  %s616_s3 = sld [smem:[#allocation2 + $0x3]]  ;;  %vm86_vm2 = vcmp.eq.s32.totalorder %v610_v0, 2  ;;  %vm93_vm3 = vcmp.eq.s32.totalorder %v610_v0, 3 }
  0x3b   :  { %s619_s23 = sld [smem:[#allocation2 + $0x4]]  ;;  %s621_s24 = sld [smem:[#allocation2 + $0x5]]  ;;  %vm100_vm4 = vcmp.eq.s32.totalorder %v610_v0, 4  ;;  %vm107_vm5 = vcmp.eq.s32.totalorder %v610_v0, 5  ;;  %vm114_vm6 = vcmp.eq.s32.totalorder %v610_v0, 6  ;;  %vm121_vm7 = vcmp.eq.s32.totalorder %v610_v0, 7 }
  0x3c   :  { %s624_s25 = sld [smem:[#allocation2 + $0x6]]  ;;  %s627_s26 = sld [smem:[#allocation2 + $0x7]]  ;;  %vm128_vm8 = vcmp.eq.s32.totalorder %v610_v0, 8  ;;  %vm135_vm9 = vcmp.eq.s32.totalorder %v610_v0, 9  ;;  %vm142_vm10 = vcmp.eq.s32.totalorder %v612_v1, 0  ;;  %vm149_vm11 = vcmp.eq.s32.totalorder %v612_v1, 1 }
  0x3d   :  { %s629_s27 = sld [smem:[#allocation2 + $0x8]]  ;;  %s633_s1 = sld [smem:[#allocation2 + $0x9]]  ;;  %vm156_vm12 = vcmp.eq.s32.totalorder %v612_v1, 2  ;;  %vm163_vm13 = vcmp.eq.s32.totalorder %v612_v1, 3  ;;  %vm170_vm14 = vcmp.eq.s32.totalorder %v612_v1, 4  ;;  %vm177_vm15 = vcmp.eq.s32.totalorder %v767_v50, 0 }
  0x3e   :  { %s635_s28 = sld [smem:[#allocation2 + $0xa]]  ;;  %s639_s29 = sld [smem:[#allocation2 + $0xb]] }
  0x3f   :  { %v74_v2 = vstv %s73_s20  ;;  %s641_s30 = sld [smem:[#allocation2 + $0xc]]  ;;  %v77_v4 = vstv %s376_s21  ;;  %s647_s5 = sld [smem:[#allocation2 + $0xd]] }
  0x40   :  { %v75_v3 = vsel %vm72_vm0, %v74_v2, 0.0  ;;  %v81_v5 = vstv %s377_s22  ;;  %s649_s6 = sld [smem:[#allocation2 + $0xe]]  ;;  %v78_v6 = vsel %vm72_vm0, %v77_v4, 0.0  ;;  %v84_v8 = vstv %s616_s3  ;;  %s658_s0 = sld [smem:[#allocation2 + $0xf]] }
  0x41   :  { %v82_v7 = vsel %vm79_vm1, %v81_v5, %v75_v3  ;;  %v88_v9 = vstv %s619_s23  ;;  %s660_s7 = sld [smem:[#allocation2 + $0x10]]  ;;  %v85_v10 = vsel %vm79_vm1, %v84_v8, %v78_v6  ;;  %v91_v12 = vstv %s621_s24  ;;  %s669_s8 = sld [smem:[#allocation2 + $0x11]] }
  0x42   :  { %v89_v11 = vsel %vm86_vm2, %v88_v9, %v82_v7  ;;  %v95_v13 = vstv %s624_s25  ;;  %s671_s9 = sld [smem:[#allocation2 + $0x12]]  ;;  %v92_v14 = vsel %vm86_vm2, %v91_v12, %v85_v10  ;;  %v98_v16 = vstv %s627_s26  ;;  %s679_s10 = sld [smem:[#allocation2 + $0x13]] }
  0x43   :  { %v96_v15 = vsel %vm93_vm3, %v95_v13, %v89_v11  ;;  %v102_v17 = vstv %s629_s27  ;;  %s681_s11 = sld [smem:[#allocation7]]  ;;  %v99_v18 = vsel %vm93_vm3, %v98_v16, %v92_v14  ;;  %v105_v20 = vstv %s633_s1  ;;  %s689_s12 = sld [smem:[#allocation7 + $0x1]] }
  0x44   :  { %v103_v19 = vsel %vm100_vm4, %v102_v17, %v96_v15  ;;  %v109_v21 = vstv %s635_s28  ;;  %s691_s13 = sld [smem:[#allocation7 + $0x2]]  ;;  %v106_v22 = vsel %vm100_vm4, %v105_v20, %v99_v18  ;;  %v112_v24 = vstv %s639_s29  ;;  %s699_s2 = sld [smem:[#allocation7 + $0x3]] }
  0x45   :  { %v110_v23 = vsel %vm107_vm5, %v109_v21, %v103_v19  ;;  %v116_v25 = vstv %s641_s30  ;;  %s701_s14 = sld [smem:[#allocation7 + $0x4]]  ;;  %v113_v26 = vsel %vm107_vm5, %v112_v24, %v106_v22  ;;  %v119_v28 = vstv %s647_s5  ;;  %s709_s15 = sld [smem:[#allocation7 + $0x5]] }
  0x46   :  { %v117_v27 = vsel %vm114_vm6, %v116_v25, %v110_v23  ;;  %v123_v29 = vstv %s649_s6  ;;  %s711_s16 = sld [smem:[#allocation7 + $0x6]]  ;;  %v120_v30 = vsel %vm114_vm6, %v119_v28, %v113_v26  ;;  %v126_v32 = vstv %s658_s0  ;;  %s719_s17 = sld [smem:[#allocation7 + $0x7]] }
  0x47   :  { %v124_v31 = vsel %vm121_vm7, %v123_v29, %v117_v27  ;;  %v130_v33 = vstv %s660_s7  ;;  %s721_s18 = sld [smem:[#allocation7 + $0x8]]  ;;  %v127_v34 = vsel %vm121_vm7, %v126_v32, %v120_v30  ;;  %v133_v36 = vstv %s669_s8  ;;  %s729_s19 = sld [smem:[#allocation7 + $0x9]] }
  0x48   :  { %v131_v35 = vsel %vm128_vm8, %v130_v33, %v124_v31  ;;  %v137_v37 = vstv %s671_s9  ;;  %s731_s20 = sld [smem:[#allocation8]]  ;;  %v134_v38 = vsel %vm128_vm8, %v133_v36, %v127_v34  ;;  %v140_v40 = vstv %s679_s10  ;;  %s741_s21 = sld [smem:[#allocation8 + $0x1]] }
  0x49   :  { %v737_v39 = vsel %vm135_vm9, %v137_v37, %v131_v35  ;;  %v144_v41 = vstv %s681_s11  ;;  %s743_s22 = sld [smem:[#allocation8 + $0x2]]  ;;  %v747_v42 = vsel %vm135_vm9, %v140_v40, %v134_v38  ;;  %v147_v44 = vstv %s689_s12  ;;  %s753_s3 = sld [smem:[#allocation8 + $0x3]] }
  0x4a   :  { %v145_v43 = vsel %vm142_vm10, %v144_v41, 0.0  ;;  %v151_v45 = vstv %s691_s13  ;;  %s755_s23 = sld [smem:[#allocation8 + $0x4]]  ;;  %v148_v46 = vsel %vm142_vm10, %v147_v44, 0.0  ;;  %v154_v48 = vstv %s699_s2  ;;  %s763_s24 = sld [smem:[#allocation8 + $0x5]] }
  0x4b   :  { %v152_v47 = vsel %vm149_vm11, %v151_v45, %v145_v43  ;;  %v158_v49 = vstv %s701_s14  ;;  %s765_s25 = sld [smem:[#allocation8 + $0x6]]  ;;  %v155_v51 = vsel %vm149_vm11, %v154_v48, %v148_v46  ;;  %v161_v53 = vstv %s709_s15  ;;  %s775_s26 = sld [smem:[#allocation8 + $0x7]] }
  0x4c   :  { %v159_v52 = vsel %vm156_vm12, %v158_v49, %v152_v47  ;;  %s777_s27 = sld [smem:[#allocation8 + $0x8]]  ;;  %v162_v54 = vsel %vm156_vm12, %v161_v53, %v155_v51  ;;  %v165_v55 = vstv %s711_s16  ;;  %v168_v56 = vstv %s719_s17  ;;  %s784_s1 = sld [smem:[#allocation8 + $0x9]] }
  0x4d   :  { %s786_s28 = sld [smem:[#allocation8 + $0xa]]  ;;  %v166_v57 = vsel %vm163_vm13, %v165_v55, %v159_v52  ;;  %v169_v58 = vsel %vm163_vm13, %v168_v56, %v162_v54  ;;  %v172_v59 = vstv %s721_s18  ;;  %v175_v60 = vstv %s729_s19  ;;  %s790_s29 = sld [smem:[#allocation8 + $0xb]] }
  0x4e   :  { %v792_v61 = vsel %vm170_vm14, %v172_v59, %v166_v57  ;;  %v794_v62 = vsel %vm170_vm14, %v175_v60, %v169_v58  ;;  %v179_v63 = vstv %s731_s20  ;;  %s798_s30 = sld [smem:[#allocation8 + $0xc]]  ;;  %s800_s5 = sld [smem:[#allocation8 + $0xd]]  ;;  %v182_v1 = vstv %s741_s21 }
  0x4f   :  { %v180_v0 = vsel %vm177_vm15, %v179_v63, 0.0  ;;  %vm184_vm0 = vcmp.eq.s32.totalorder %v767_v50, 1  ;;  %v186_v2 = vstv %s743_s22  ;;  %s805_s6 = sld [smem:[#allocation8 + $0xe]]  ;;  %s807_s0 = sld [smem:[#allocation8 + $0xf]]  ;;  %v183_v3 = vsel %vm177_vm15, %v182_v1, 0.0 }
  0x50   :  { %v187_v4 = vsel %vm184_vm0, %v186_v2, %v180_v0  ;;  %v189_v5 = vstv %s753_s3  ;;  %vm191_vm1 = vcmp.eq.s32.totalorder %v767_v50, 2  ;;  %s811_s7 = sld [smem:[#allocation8 + $0x10]]  ;;  %v193_v7 = vstv %s755_s23  ;;  %s816_s8 = sld [smem:[#allocation8 + $0x11]] }
  0x51   :  { %v190_v6 = vsel %vm184_vm0, %v189_v5, %v183_v3  ;;  %v196_v8 = vstv %s763_s24  ;;  %vm198_vm2 = vcmp.eq.s32.totalorder %v767_v50, 3  ;;  %s818_s9 = sld [smem:[#allocation8 + $0x12]]  ;;  %v194_v9 = vsel %vm191_vm1, %v193_v7, %v187_v4  ;;  %s822_s10 = sld [smem:[#allocation8 + $0x13]] }
  0x52   :  { %v197_v10 = vsel %vm191_vm1, %v196_v8, %v190_v6  ;;  %v200_v11 = vstv %s765_s25  ;;  %v203_v12 = vstv %s775_s26  ;;  %vm205_vm3 = vcmp.eq.s32.totalorder %v767_v50, 4  ;;  %s826_s11 = sld [smem:[#allocation8 + $0x14]]  ;;  %s828_s12 = sld [smem:[#allocation8 + $0x15]] }
  0x53   :  { %v201_v13 = vsel %vm198_vm2, %v200_v11, %v194_v9  ;;  %v204_v14 = vsel %vm198_vm2, %v203_v12, %v197_v10  ;;  %v207_v15 = vstv %s777_s27  ;;  %v210_v17 = vstv %s784_s1  ;;  %s833_s13 = sld [smem:[#allocation8 + $0x16]]  ;;  %s835_s2 = sld [smem:[#allocation8 + $0x17]] }
  0x54   :  { %v208_v16 = vsel %vm205_vm3, %v207_v15, %v201_v13  ;;  %vm212_vm4 = vcmp.eq.s32.totalorder %v767_v50, 5  ;;  %v214_v18 = vstv %s786_s28  ;;  %v211_v19 = vsel %vm205_vm3, %v210_v17, %v204_v14  ;;  %s839_s14 = sld [smem:[#allocation8 + $0x18]]  ;;  %s844_s15 = sld [smem:[#allocation8 + $0x19]] }
  0x55   :  { %v215_v20 = vsel %vm212_vm4, %v214_v18, %v208_v16  ;;  %v217_v21 = vstv %s790_s29  ;;  %vm219_vm5 = vcmp.eq.s32.totalorder %v767_v50, 6  ;;  %v221_v23 = vstv %s798_s30  ;;  %s846_s16 = sld [smem:[#allocation8 + $0x1a]]  ;;  %s850_s17 = sld [smem:[#allocation8 + $0x1b]] }
  0x56   :  { %v218_v22 = vsel %vm212_vm4, %v217_v21, %v211_v19  ;;  %v224_v24 = vstv %s800_s5  ;;  %vm226_vm6 = vcmp.eq.s32.totalorder %v767_v50, 7  ;;  %v222_v25 = vsel %vm219_vm5, %v221_v23, %v215_v20  ;;  %s854_s18 = sld [smem:[#allocation8 + $0x1c]]  ;;  %s856_s19 = sld [smem:[#allocation8 + $0x1d]] }
  0x57   :  { %v225_v26 = vsel %vm219_vm5, %v224_v24, %v218_v22  ;;  %v228_v27 = vstv %s805_s6  ;;  %v231_v28 = vstv %s807_s0  ;;  %vm233_vm7 = vcmp.eq.s32.totalorder %v767_v50, 8  ;;  %s861_s20 = sld [smem:[#allocation8 + $0x1e]]  ;;  %s863_s21 = sld [smem:[#allocation8 + $0x1f]] }
  0x58   :  { %v229_v29 = vsel %vm226_vm6, %v228_v27, %v222_v25  ;;  %v232_v30 = vsel %vm226_vm6, %v231_v28, %v225_v26  ;;  %v235_v31 = vstv %s811_s7  ;;  %v238_v33 = vstv %s816_s8  ;;  %s867_s22 = sld [smem:[#allocation8 + $0x20]]  ;;  %s872_s3 = sld [smem:[#allocation8 + $0x21]] }
  0x59   :  { %v236_v32 = vsel %vm233_vm7, %v235_v31, %v229_v29  ;;  %vm240_vm8 = vcmp.eq.s32.totalorder %v767_v50, 9  ;;  %v242_v34 = vstv %s818_s9  ;;  %v239_v35 = vsel %vm233_vm7, %v238_v33, %v232_v30  ;;  %s874_s23 = sld [smem:[#allocation8 + $0x22]]  ;;  %s878_s24 = sld [smem:[#allocation8 + $0x23]] }
  0x5a   :  { %v243_v36 = vsel %vm240_vm8, %v242_v34, %v236_v32  ;;  %v245_v37 = vstv %s822_s10  ;;  %vm247_vm9 = vcmp.eq.s32.totalorder %v767_v50, 10  ;;  %v249_v40 = vstv %s826_s11  ;;  %s882_s25 = sld [smem:[#allocation8 + $0x24]]  ;;  %s884_s26 = sld [smem:[#allocation8 + $0x25]] }
  0x5b   :  { %v246_v38 = vsel %vm240_vm8, %v245_v37, %v239_v35  ;;  %v252_v41 = vstv %s828_s12  ;;  %vm254_vm10 = vcmp.eq.s32.totalorder %v767_v50, 11  ;;  %v250_v43 = vsel %vm247_vm9, %v249_v40, %v243_v36  ;;  %s889_s27 = sld [smem:[#allocation8 + $0x26]]  ;;  %s891_s1 = sld [smem:[#allocation8 + $0x27]] }
  0x5c   :  { %v253_v44 = vsel %vm247_vm9, %v252_v41, %v246_v38  ;;  %v256_v45 = vstv %s833_s13  ;;  %v259_v46 = vstv %s835_s2  ;;  %vm261_vm11 = vcmp.eq.s32.totalorder %v767_v50, 12  ;;  %s895_s28 = sld [smem:[#allocation8 + $0x28]]  ;;  %s900_s29 = sld [smem:[#allocation8 + $0x29]] }
  0x5d   :  { %v257_v47 = vsel %vm254_vm10, %v256_v45, %v250_v43  ;;  %v260_v48 = vsel %vm254_vm10, %v259_v46, %v253_v44  ;;  %v263_v49 = vstv %s839_s14  ;;  %v266_v52 = vstv %s844_s15  ;;  %s902_s30 = sld [smem:[#allocation8 + $0x2a]]  ;;  %s906_s5 = sld [smem:[#allocation8 + $0x2b]] }
  0x5e   :  { %v264_v51 = vsel %vm261_vm11, %v263_v49, %v257_v47  ;;  %vm268_vm12 = vcmp.eq.s32.totalorder %v767_v50, 13  ;;  %v270_v53 = vstv %s846_s16  ;;  %v267_v54 = vsel %vm261_vm11, %v266_v52, %v260_v48  ;;  %s910_s6 = sld [smem:[#allocation8 + $0x2c]]  ;;  %s912_s0 = sld [smem:[#allocation8 + $0x2d]] }
  0x5f   :  { %v271_v55 = vsel %vm268_vm12, %v270_v53, %v264_v51  ;;  %v273_v56 = vstv %s850_s17  ;;  %vm275_vm13 = vcmp.eq.s32.totalorder %v767_v50, 14  ;;  %v277_v58 = vstv %s854_s18  ;;  %s917_s7 = sld [smem:[#allocation8 + $0x2e]]  ;;  %s919_s8 = sld [smem:[#allocation8 + $0x2f]] }
  0x60   :  { %v274_v57 = vsel %vm268_vm12, %v273_v56, %v267_v54  ;;  %v280_v59 = vstv %s856_s19  ;;  %vm282_vm14 = vcmp.eq.s32.totalorder %v767_v50, 15  ;;  %v278_v60 = vsel %vm275_vm13, %v277_v58, %v271_v55  ;;  %s923_s9 = sld [smem:[#allocation8 + $0x30]]  ;;  %s928_s10 = sld [smem:[#allocation8 + $0x31]] }
  0x61   :  { %v281_v63 = vsel %vm275_vm13, %v280_v59, %v274_v57  ;;  %v284_v0 = vstv %s861_s20  ;;  %v287_v1 = vstv %s863_s21  ;;  %vm289_vm15 = vcmp.eq.s32.totalorder %v767_v50, 16  ;;  %s554_s11 = smov [#allocation11]  }
  0x62   :  { %v285_v2 = vsel %vm282_vm14, %v284_v0, %v278_v60  ;;  %v288_v3 = vsel %vm282_vm14, %v287_v1, %v281_v63  ;;  %v291_v4 = vstv %s867_s22  ;;  %v294_v6 = vstv %s872_s3  ;;  %s364_s12 = sshll.u32 %s554_s11, 4  ;;  %s365_s12 = int_to_ptr.vmem [resolvable:$true] %s364_s12 }
  0x63   :  { %v292_v5 = vsel %vm289_vm15, %v291_v4, %v285_v2  ;;  %vm296_vm0 = vcmp.eq.s32.totalorder %v767_v50, 17  ;;  %v298_v7 = vstv %s874_s23  ;;  %v295_v8 = vsel %vm289_vm15, %v294_v6, %v288_v3  ;;  %s516_s13 = scalar_lea.vmem %s365_s12, 128  ;;  %p521_p8 = scmp.lt.s32.totalorder %s365_s12, %s365_s12 }
  0x64   :  { %v299_v9 = vsel %vm296_vm0, %v298_v7, %v292_v5  ;;  %v301_v10 = vstv %s878_s24  ;;  %vm303_vm1 = vcmp.eq.s32.totalorder %v767_v50, 18  ;;  %v305_v12 = vstv %s882_s25  ;;  %p517_p7 = scmp.ne.s32.totalorder %s365_s12, %s516_s13  ;;  %p522_p9 = scmp.lt.s32.totalorder %s516_s13, %s516_s13 }
  0x65   :  { %v302_v11 = vsel %vm296_vm0, %v301_v10, %v295_v8  ;;  %v308_v13 = vstv %s884_s26  ;;  %vm310_vm2 = vcmp.eq.s32.totalorder %v767_v50, 19  ;;  %v306_v14 = vsel %vm303_vm1, %v305_v12, %v299_v9 }
  0x66   :  { %v309_v15 = vsel %vm303_vm1, %v308_v13, %v302_v11  ;;  %v312_v16 = vstv %s889_s27  ;;  %v315_v17 = vstv %s891_s1  ;;  %vm317_vm3 = vcmp.eq.s32.totalorder %v767_v50, 20  ;;  %p523_p10 = por %p522_p9, %p521_p8 }
  0x67   :  { %v313_v18 = vsel %vm310_vm2, %v312_v16, %v306_v14  ;;  %v316_v19 = vsel %vm310_vm2, %v315_v17, %v309_v15  ;;  %v319_v20 = vstv %s895_s28  ;;  %v322_v22 = vstv %s900_s29 }
  0x68   :  { %v320_v21 = vsel %vm317_vm3, %v319_v20, %v313_v18  ;;  %vm324_vm4 = vcmp.eq.s32.totalorder %v767_v50, 21  ;;  %v326_v23 = vstv %s902_s30  ;;  %v323_v24 = vsel %vm317_vm3, %v322_v22, %v316_v19  ;;  %p524_p11 = pnand %p523_p10, %p517_p7 }
  0x69   :  { %v327_v25 = vsel %vm324_vm4, %v326_v23, %v320_v21  ;;  %v329_v26 = vstv %s906_s5  ;;  %vm331_vm5 = vcmp.eq.s32.totalorder %v767_v50, 22  ;;  %v333_v28 = vstv %s910_s6 }
  0x6a   :  { %v330_v27 = vsel %vm324_vm4, %v329_v26, %v323_v24  ;;  %v336_v29 = vstv %s912_s0  ;;  %vm338_vm6 = vcmp.eq.s32.totalorder %v767_v50, 23  ;;  %v334_v30 = vsel %vm331_vm5, %v333_v28, %v327_v25 }
  0x6b   :  { %v337_v31 = vsel %vm331_vm5, %v336_v29, %v330_v27  ;;  %v340_v32 = vstv %s917_s7  ;;  %v343_v33 = vstv %s919_s8  ;;  %vm345_vm7 = vcmp.eq.s32.totalorder %v767_v50, 24 }
  0x6c   :  { %v341_v34 = vsel %vm338_vm6, %v340_v32, %v334_v30  ;;  %v344_v35 = vsel %vm338_vm6, %v343_v33, %v337_v31  ;;  %v347_v36 = vstv %s923_s9  ;;  %v350_v38 = vstv %s928_s10 }
  0x6d   :  { %v348_v37 = vsel %vm345_vm7, %v347_v36, %v341_v34  ;;  %v352_v40 = vmul.f32 %v792_v61, %v737_v39  ;;  %v354_v41 = vmul.f32 %v794_v62, %v747_v42  ;;  %v351_v43 = vsel %vm345_vm7, %v350_v38, %v344_v35 }
  0x6f   :  { %v353_v44 = vmul.f32 %v352_v40, %v348_v37  ;;  %v355_v45 = vmul.f32 %v354_v41, %v351_v43 }
  0x71   :  { %v356_v46 = vadd.f32 %v355_v45, %v353_v44 }
  0x73   :  { %357 = vst [vmem:[#allocation11] sm:$0xff] %v356_v46 }
  0x74   :  { %527 = shalt.err (!%p524_p11)
}
  0x75   :  { %s528_s15 = scalar_lea.hbm %s967_s4, 128 }
  0x76   :  { %p529_p12 = scmp.ne.s32.totalorder %s967_s4, %s528_s15  ;;  %p532_p13 = scmp.lt.u32.totalorder %s528_s15, %s967_s4 }
  0x78   :  { %p534_p0 = pnand %p532_p13, %p529_p12 }
  0x7a   :  { %537 = shalt.err (!%p534_p0)
}
  0x7b   :  { %367 = dma.vmem_to_hbm [thread:$0]  %s365_s12, 128, %s967_s4, [#allocation4]  }
  0x7c   :  { %546 = dma.done.wait [#allocation4], 128  }
  0x7d   :  { %547 = vsyncadd [#allocation4], 4294967168 }
  0x7e   :  { %371 = vsyncpa [#allocation3], 1 }
  0x7f   :  { %372 = vsyncpa [#allocation4], 1 }
  0x80   :  { %373 = vsyncpa [#allocation5], 1 }
  0x81   :  { %374 = vsyncpa [#allocation6], 1 }
  0x82   :  { %375 = vsyncpa [#allocation9], 1 }

</bundles_post_ra>
